<compile_context>
chip_gen: v7x
topology: tpu7x:2x2x1
jax: 0.10.0
libtpu: 0.0.40
codegen_flags: <defaults>
</compile_context>

<pallas_src>
import jax
import jax.numpy as jnp
from jax.experimental import pallas as pl
from jax.experimental.pallas import tpu as pltpu


def _make_mlp_kernel(tf):
    """Kernel over a 2-D grid: i = token tile ("parallel"), k = FFN tile ("arbitrary")."""

    def _mlp_kernel(x_ref, w1_ref, w2_ref, o_ref, acc_ref):
        # x_ref : (tm, H)      bf16   token tile
        # w1_ref: (H, 2*tf)    bf16   packed [gate | up] FFN tile of dense_h_to_4h
        # w2_ref: (tf, H)      bf16   dense_4h_to_h FFN tile
        # o_ref : (tm, H)      bf16   output tile
        # acc_ref:(tm, H)      f32    persistent accumulator across the FFN axis
        k = pl.program_id(1)

        @pl.when(k == 0)
        def _():
            acc_ref[...] = jnp.zeros_like(acc_ref)

        x = x_ref[...]
        # Single up-projection dot; f32 accumulation on the MXU.
        h = jnp.dot(x, w1_ref[...], preferred_element_type=jnp.float32)  # (tm, 2*tf)
        a = h[:, :tf]           # gate half (tf is a multiple of 128 -> free lane slice)
        b = h[:, tf:]           # up half
        # SwiGLU in f32 (sigmoid lands on the EUP); cast to bf16 for the MXU feed.
        g = (a * jax.nn.sigmoid(a) * b).astype(x_ref.dtype)
        # Down-projection partial sum into the persistent f32 accumulator.
        acc_ref[...] += jnp.dot(g, w2_ref[...], preferred_element_type=jnp.float32)

        @pl.when(k == pl.num_programs(1) - 1)
        def _():
            o_ref[...] = acc_ref[...].astype(o_ref.dtype)

    return _mlp_kernel


def _round_up(x, m):
    return ((x + m - 1) // m) * m


def _vmem_capacity_bytes():
    """Physical VMEM per TensorCore; conservative 64 MiB fallback (valid everywhere)."""
    try:
        info = pltpu.get_tpu_info()
        cap = getattr(info, "vmem_capacity_bytes", None)
        if cap:
            return int(cap)
    except Exception:
        pass
    return 64 * 1024 * 1024


def _default_tiles(vmem_cap):
    # 64 MiB parts (v7x): tm=512, tf=512 -> ~48 MiB working set at H=4096.
    # 128 MiB parts (v5e/v6e): tm=1024, tf=512 -> ~72 MiB working set at H=4096,
    # which is past the ~650 flops/byte roofline crossover on v6e.
    if vmem_cap <= 64 * 1024 * 1024:
        return 512, 512
    return 1024, 512


def _working_set_bytes(tm, tf, H, bpe):
    # Double-buffered pipeline tiles (x, out, W1 packed, W2) + f32 accumulator.
    return 2 * (2 * tm * H + 3 * tf * H) * bpe + tm * H * 4


def glm4_mlp(x, w_gate, w_up, w2, *, tm=None, tf=None, vmem_limit_bytes=None):
    """x: (T, H); w_gate/w_up: (H, F); w2: (F, H)  ->  (T, H)."""
    T, H = x.shape
    F = w_gate.shape[1]
    assert w_gate.shape == (H, F) and w_up.shape == (H, F) and w2.shape == (F, H)
    dtype = x.dtype
    bpe = jnp.dtype(dtype).itemsize

    vmem_cap = _vmem_capacity_bytes()
    tm_d, tf_d = _default_tiles(vmem_cap)
    tm = tm_d if tm is None else tm
    tf = tf_d if tf is None else tf
    tm = _round_up(tm, 16)      # bf16 sublane packing
    tf = _round_up(tf, 128)     # lane-aligned FFN tiles

    # Clamp to the (padded) problem size for small shapes.
    if T <= tm:
        tm = _round_up(T, 16)
    if F <= tf:
        tf = _round_up(F, 128)

    # Shrink tiles if the working set would overflow this generation's VMEM.
    budget = int(0.80 * vmem_cap)
    while _working_set_bytes(tm, tf, H, bpe) > budget and tm > 128:
        tm -= 128
    while _working_set_bytes(tm, tf, H, bpe) > budget and tf > 128:
        tf -= 128

    # cdiv grid with zero padding: arbitrary T / F supported without VMEM blowups.
    T_pad = _round_up(T, tm)
    F_pad = _round_up(F, tf)
    grid = (T_pad // tm, F_pad // tf)

    if T_pad != T:
        x = jnp.pad(x, ((0, T_pad - T), (0, 0)))
    if F_pad != F:
        w_gate = jnp.pad(w_gate, ((0, 0), (0, F_pad - F)))
        w_up = jnp.pad(w_up, ((0, 0), (0, F_pad - F)))
        w2 = jnp.pad(w2, ((0, F_pad - F), (0, 0)))

    # Pack gate/up FFN tiles side by side: chunk k of w1 holds [gate_k | up_k],
    # so one (H, 2*tf) block per grid step feeds a single MXU dot.
    # (In production this packing would be done once at weight-load time.)
    nk = F_pad // tf
    w1 = jnp.concatenate(
        [w_gate.reshape(H, nk, tf), w_up.reshape(H, nk, tf)], axis=2
    ).reshape(H, 2 * F_pad)

    vmem_needed = _working_set_bytes(tm, tf, H, bpe)
    if vmem_limit_bytes is None:
        vmem_limit_bytes = min(
            max(int(1.25 * vmem_needed) + (4 << 20), 32 << 20),
            int(0.85 * vmem_cap),
        )

    cost = pl.CostEstimate(
        flops=2 * T_pad * H * (2 * F_pad) + 2 * T_pad * F_pad * H,
        transcendentals=T_pad * F_pad,
        bytes_accessed=(T_pad * H                                   # x read
                        + grid[0] * (H * 2 * F_pad + F_pad * H)     # weights re-streamed per token tile
                        + T_pad * H) * bpe,                         # output write
    )

    out = pl.pallas_call(
        _make_mlp_kernel(tf),
        out_shape=jax.ShapeDtypeStruct((T_pad, H), dtype),
        grid_spec=pltpu.PrefetchScalarGridSpec(
            num_scalar_prefetch=0,
            grid=grid,
            in_specs=[
                pl.BlockSpec((tm, H), lambda i, k: (i, 0)),        # x token tile
                pl.BlockSpec((H, 2 * tf), lambda i, k: (0, k)),    # packed [gate|up] W1 tile
                pl.BlockSpec((tf, H), lambda i, k: (k, 0)),        # W2 tile
            ],
            out_specs=pl.BlockSpec((tm, H), lambda i, k: (i, 0)),
            scratch_shapes=[pltpu.VMEM((tm, H), jnp.float32)],
        ),
        compiler_params=pltpu.CompilerParams(
            dimension_semantics=("parallel", "arbitrary"),
            vmem_limit_bytes=vmem_limit_bytes,
        ),
        cost_estimate=cost,
    )(x, w1, w2)

    if T_pad != T:
        out = out[:T]
    return out


def ref_mlp(x, w1, w2):
    h = jnp.dot(x.astype(jnp.float32), w1.astype(jnp.float32))
    f = h.shape[-1] // 2
    a, b = h[:, :f], h[:, f:]
    g = (a * jax.nn.sigmoid(a) * b).astype(x.dtype).astype(jnp.float32)
    return jnp.dot(g, w2.astype(jnp.float32)).astype(x.dtype)


if __name__ == "__main__":
    # Small config consistent with the module: hidden_size=32, ffn_hidden_size=64,
    # add_bias_linear=False, dtype=bfloat16. Tokens = batch(2) * seq(8) = 16.
    hidden_size = 32
    ffn_hidden_size = 64
    batch, seq = 2, 8
    T = batch * seq

    key = jax.random.PRNGKey(0)
    kx, k1, k2 = jax.random.split(key, 3)

    x = (jax.random.normal(kx, (batch, seq, hidden_size), dtype=jnp.float32)
         * 0.5).astype(jnp.bfloat16)
    # torch.nn.Linear weights are (out, in); we keep them as (in, out) here.
    w1 = (jax.random.normal(k1, (hidden_size, 2 * ffn_hidden_size),
                            dtype=jnp.float32) * 0.05).astype(jnp.bfloat16)
    w2 = (jax.random.normal(k2, (ffn_hidden_size, hidden_size),
                            dtype=jnp.float32) * 0.05).astype(jnp.bfloat16)

    # Split dense_h_to_4h into its gate / up halves (matches torch.chunk(x, 2, -1)).
    w_gate = w1[:, :ffn_hidden_size]
    w_up = w1[:, ffn_hidden_size:]

    x2d = x.reshape(T, hidden_size)
    out = glm4_mlp(x2d, w_gate, w_up, w2)
    out = jax.block_until_ready(out)
    out = out.reshape(batch, seq, hidden_size)

    ref = ref_mlp(x2d, w1, w2).reshape(batch, seq, hidden_size)
    err = jnp.max(jnp.abs(out.astype(jnp.float32) - ref.astype(jnp.float32)))
    assert out.shape == (batch, seq, hidden_size)
    assert out.dtype == jnp.bfloat16
    assert float(err) < 1e-1, f"max abs err {err}"

    print("KERNEL_OK")
</pallas_src>

<mosaic_0001>
module attributes {stable_mosaic.version = 11 : i64} {
  func.func @_mlp_kernel(%arg0: i32, %arg1: i32, %arg2: memref<16x32xbf16, #tpu.memory_space<vmem>>, %arg3: memref<32x256xbf16, #tpu.memory_space<vmem>>, %arg4: memref<128x32xbf16, #tpu.memory_space<vmem>>, %arg5: memref<16x32xbf16, #tpu.memory_space<vmem>>, %arg6: memref<16x32xf32, #tpu.memory_space<vmem>>) attributes {dimension_semantics = [#tpu.dimension_semantics<parallel>, #tpu.dimension_semantics<arbitrary>], iteration_bounds = array<i64: 1, 1>, scalar_prefetch = 0 : i64, scratch_operands = 1 : i64, tpu.core_type = #tpu.core_type<tc>, window_params = [{transform_indices = @transform_0, window_bounds = array<i64: 16, 32>}, {transform_indices = @transform_1, window_bounds = array<i64: 32, 256>}, {transform_indices = @transform_2, window_bounds = array<i64: 128, 32>}, {transform_indices = @transform_3, window_bounds = array<i64: 16, 32>}]} {
    %c0_i32 = arith.constant 0 : i32
    %0 = arith.cmpi eq, %arg1, %c0_i32 : i32
    %1 = arith.extui %0 : i1 to i32
    %c0_i32_0 = arith.constant 0 : i32
    %2 = arith.cmpi ne, %1, %c0_i32_0 : i32
    scf.if %2 {
      %cst_14 = arith.constant 0.000000e+00 : f32
      %24 = vector.broadcast %cst_14 : f32 to vector<16x32xf32>
      %c0_15 = arith.constant 0 : index
      %c0_16 = arith.constant 0 : index
      %25 = vector.load %arg6[%c0_15, %c0_16] : memref<16x32xf32, #tpu.memory_space<vmem>>, vector<16x32xf32>
      tpu.vector_store %arg6[%c0_15, %c0_16], %24 {strides = array<i32>} : memref<16x32xf32, #tpu.memory_space<vmem>>, vector<16x32xf32>,
    } else {
    }
    %c0 = arith.constant 0 : index
    %c0_1 = arith.constant 0 : index
    %3 = vector.load %arg2[%c0, %c0_1] : memref<16x32xbf16, #tpu.memory_space<vmem>>, vector<16x32xbf16>
    %c0_2 = arith.constant 0 : index
    %c0_3 = arith.constant 0 : index
    %4 = vector.load %arg3[%c0_2, %c0_3] : memref<32x256xbf16, #tpu.memory_space<vmem>>, vector<32x256xbf16>
    %cst = arith.constant dense<0.000000e+00> : vector<16x256xf32>
    %5 = tpu.matmul %3, %4, %cst {dimension_numbers = #tpu.dot_dimension_numbers<[1], [0], [0], [1], [0, 0, 1, 1], [], []>} : vector<16x32xbf16>, vector<32x256xbf16>, vector<16x256xf32> -> vector<16x256xf32>
    %6 = vector.extract_strided_slice %5 {offsets = [0, 0], sizes = [16, 128], strides = [1, 1]} : vector<16x256xf32> to vector<16x128xf32>
    %7 = vector.extract_strided_slice %5 {offsets = [0, 128], sizes = [16, 128], strides = [1, 1]} : vector<16x256xf32> to vector<16x128xf32>
    %8 = arith.negf %6 : vector<16x128xf32>
    %9 = math.exp %8 : vector<16x128xf32>
    %cst_4 = arith.constant 1.000000e+00 : f32
    %10 = vector.broadcast %cst_4 : f32 to vector<16x128xf32>
    %11 = arith.addf %10, %9 : vector<16x128xf32>
    %12 = arith.divf %10, %11 : vector<16x128xf32>
    %13 = arith.mulf %6, %12 : vector<16x128xf32>
    %14 = arith.mulf %13, %7 : vector<16x128xf32>
    %15 = arith.truncf %14 : vector<16x128xf32> to vector<16x128xbf16>
    %c0_5 = arith.constant 0 : index
    %c0_6 = arith.constant 0 : index
    %16 = vector.load %arg6[%c0_5, %c0_6] : memref<16x32xf32, #tpu.memory_space<vmem>>, vector<16x32xf32>
    %c0_7 = arith.constant 0 : index
    %c0_8 = arith.constant 0 : index
    %17 = vector.load %arg4[%c0_7, %c0_8] : memref<128x32xbf16, #tpu.memory_space<vmem>>, vector<128x32xbf16>
    %cst_9 = arith.constant dense<0.000000e+00> : vector<16x32xf32>
    %18 = tpu.matmul %15, %17, %cst_9 {dimension_numbers = #tpu.dot_dimension_numbers<[1], [0], [0], [1], [0, 0, 1, 1], [], []>} : vector<16x128xbf16>, vector<128x32xbf16>, vector<16x32xf32> -> vector<16x32xf32>
    %19 = arith.addf %16, %18 : vector<16x32xf32>
    %c0_10 = arith.constant 0 : index
    %c0_11 = arith.constant 0 : index
    %20 = vector.load %arg6[%c0_10, %c0_11] : memref<16x32xf32, #tpu.memory_space<vmem>>, vector<16x32xf32>
    tpu.vector_store %arg6[%c0_10, %c0_11], %19 {strides = array<i32>} : memref<16x32xf32, #tpu.memory_space<vmem>>, vector<16x32xf32>,
    %c0_i32_12 = arith.constant 0 : i32
    %21 = arith.cmpi eq, %arg1, %c0_i32_12 : i32
    %22 = arith.extui %21 : i1 to i32
    %c0_i32_13 = arith.constant 0 : i32
    %23 = arith.cmpi ne, %22, %c0_i32_13 : i32
    scf.if %23 {
      %c0_14 = arith.constant 0 : index
      %c0_15 = arith.constant 0 : index
      %24 = vector.load %arg6[%c0_14, %c0_15] : memref<16x32xf32, #tpu.memory_space<vmem>>, vector<16x32xf32>
      %25 = arith.truncf %24 : vector<16x32xf32> to vector<16x32xbf16>
      %c0_16 = arith.constant 0 : index
      %c0_17 = arith.constant 0 : index
      %26 = vector.load %arg5[%c0_16, %c0_17] : memref<16x32xbf16, #tpu.memory_space<vmem>>, vector<16x32xbf16>
      tpu.vector_store %arg5[%c0_16, %c0_17], %25 {strides = array<i32>} : memref<16x32xbf16, #tpu.memory_space<vmem>>, vector<16x32xbf16>,
    } else {
    }
    return
  }
  func.func @transform_0(%arg0: i32, %arg1: i32) -> (i32, i32) {
    %c0_i32 = arith.constant 0 : i32
    %c0_i32_0 = arith.constant 0 : i32
    return %arg0, %c0_i32 : i32, i32
  }
  func.func @transform_1(%arg0: i32, %arg1: i32) -> (i32, i32) {
    %c0_i32 = arith.constant 0 : i32
    %c0_i32_0 = arith.constant 0 : i32
    return %c0_i32, %arg1 : i32, i32
  }
  func.func @transform_2(%arg0: i32, %arg1: i32) -> (i32, i32) {
    %c0_i32 = arith.constant 0 : i32
    %c0_i32_0 = arith.constant 0 : i32
    return %arg1, %c0_i32 : i32, i32
  }
  func.func @transform_3(%arg0: i32, %arg1: i32) -> (i32, i32) {
    %c0_i32 = arith.constant 0 : i32
    %c0_i32_0 = arith.constant 0 : i32
    return %arg0, %c0_i32 : i32, i32
  }
}

</mosaic_0001>

<bundles_post_ra>
// kernel: tpu_custom_call.1
= control target key start
LH: loop header
LB: loop body
LE: loop exit
PB: predicated region body
PF: predicated region fallthrough
CT: control target
= control target key end

     0   :  { %v363_v2 = vmov 0   ;;  %vm20_vm0 = vcmask 261120   ;;  %s445_s0 = inlined_call_operand.vmem [shape: bf16[16,32], index: 0, kind: input, shape index: {}]   ;;  %s446_s1 = inlined_call_operand.vmem [shape: bf16[32,256], index: 1, kind: input, shape index: {}]   ;;  %s447_s2 = inlined_call_operand.vmem [shape: bf16[128,32], index: 2, kind: input, shape index: {}]   ;;  %s448_s3 = inlined_call_operand.hbm [shape: bf16[16,32], index: 3, kind: output, shape index: {}]  }
   0x1   :  { %v316_v0 = vld [vmem:[%s446_s1 + $0x4] ss:$8 sps:$4 sm:$0xff]   ;;  %v318_v1 = vld [vmem:[%s446_s1] ss:$8 sps:$4 sm:$0xff]   ;;  %90 = vmatprep.mubr.bf16.mxu0 %v363_v2  ;;  %v319_v3 = vld [vmem:[%s446_s1 + $0x14] ss:$8 sps:$4 sm:$0xff]  }
   0x2   :  { %58 = vmatprep.subr.bf16.mxu0 %v316_v0  ;;  %v321_v4 = vld [vmem:[%s446_s1 + $0x10] ss:$8 sps:$4 sm:$0xff]   ;;  %v322_v5 = vld [vmem:[%s445_s0] sm:$0xff]  }
   0x3   :  { %59 = vmatpush1.bf16.msra.mxu0 %v318_v1 }
   0x4   :  { %60 = vmatprep.subr.bf16.mxu0 %v319_v3 }
   0x7   :  { %61 = vmatpush1.bf16.msra.mxu0 %v321_v4 }
   0x8   :  { %8 = vsyncpa [#allocation4], 0  ;;  %v323_v6 = vld [vmem:[%s447_s2] sm:$0xff]   ;;  %v364_v7 = vmov 0.0   ;;  %v324_v8 = vld [vmem:[%s447_s2 + $0x8] sm:$0xff]   ;;  %vm365_vm1 = vmmov 0  }
   0x9   :  { %290 = vmatprep.subr.bf16.mxu1 %v364_v7  ;;  %21 = vst.msk [vmem:[#allocation2] sm:$0xff] %vm20_vm0, %v364_v7  ;;  %22 = vst.msk [vmem:[#allocation2 + $0x8] sm:$0xff] %vm20_vm0, %v364_v7  ;;  %v325_v9 = vld [vmem:[%s447_s2 + $0x10] sm:$0xff]   ;;  %v326_v10 = vld [vmem:[%s447_s2 + $0x18] sm:$0xff]   ;;  %306 = vmatprep.mubr.msk.bf16.mxu1 %vm365_vm1, %v364_v7  ;;  %vm242_vm2 = vcmask 257024  }
   0xa   :  { %266 = vmatmul.mubr.msk.bf16.vlgmr.msra.gmra.mrb[0].mxu0 %vm20_vm0, %v322_v5  ;;  %291 = vmatpush3.bf16.msra.mxu1 %v323_v6  ;;  %v327_v11 = vld [vmem:[%s447_s2 + $0x20] sm:$0xff]   ;;  %v328_v12 = vld [vmem:[%s447_s2 + $0x28] sm:$0xff]   ;;  %v329_v13 = vld [vmem:[%s447_s2 + $0x30] sm:$0xff]  }
   0xb   :  { %292 = vmatprep.subr.bf16.mxu1 %v364_v7  ;;  %v330_v14 = vld [vmem:[%s447_s2 + $0x38] sm:$0xff]   ;;  %s366_s2 = smov [#allocation3]  }
   0xc   :  { %s250_s9 = sshll.u32 %s366_s2, 4  ;;  %s251_s9 = int_to_ptr.vmem [resolvable:$true] %s250_s9 }
   0xd   :  { %s339_s10 = scalar_lea.vmem %s251_s9, 128  ;;  %p344_p1 = scmp.lt.s32.totalorder %s251_s9, %s251_s9 }
   0xe   :  { %293 = vmatpush3.bf16.msra.mxu1 %v324_v8  ;;  %p340_p0 = scmp.ne.s32.totalorder %s251_s9, %s339_s10  ;;  %p345_p2 = scmp.lt.s32.totalorder %s339_s10, %s339_s10 }
   0xf   :  { %294 = vmatprep.subr.bf16.mxu1 %v364_v7 }
  0x10   :  { %v118_v32 = vld [vmem:[#allocation2] sm:$0xff]  ;;  %v119_v34 = vld [vmem:[#allocation2 + $0x8] sm:$0xff]  ;;  %p346_p3 = por %p345_p2, %p344_p1 }
  0x12   :  { %295 = vmatpush3.bf16.msra.mxu1 %v325_v9  ;;  %p347_p4 = pnand %p346_p3, %p340_p0 }
  0x13   :  { %296 = vmatprep.subr.bf16.mxu1 %v364_v7 }
  0x16   :  { %297 = vmatpush3.bf16.msra.mxu1 %v326_v10 }
  0x17   :  { %298 = vmatprep.subr.bf16.mxu1 %v364_v7 }
  0x1a   :  { %299 = vmatpush3.bf16.msra.mxu1 %v327_v11 }
  0x1b   :  { %300 = vmatprep.subr.bf16.mxu1 %v364_v7 }
  0x1e   :  { %301 = vmatpush3.bf16.msra.mxu1 %v328_v12 }
  0x1f   :  { %302 = vmatprep.subr.bf16.mxu1 %v364_v7 }
  0x22   :  { %303 = vmatpush3.bf16.msra.mxu1 %v329_v13 }
  0x23   :  { %304 = vmatprep.subr.bf16.mxu1 %v364_v7 }
  0x26   :  { %305 = vmatpush3.bf16.msra.mxu1 %v330_v14 }
  0xdd   :  { %v92_v15 = vpop.f32.mrb[0].mxu0 }
  0xde   :  { %v267_v16 = vmul.f32 -1.442695, %v92_v15  ;;  %v94_v17 = vpop.f32.mrb[1].mxu0 }
  0xdf   :  { %v96_v18 = vpop.f32.mrb[2].mxu0 }
  0xe0   :  { %331 = vpow2.f32 %v267_v16  ;;  %v268_v19 = vmul.f32 -1.442695, %v96_v18  ;;  %v98_v20 = vpop.f32.mrb[3].mxu0 }
  0xe2   :  { %333 = vpow2.f32 %v268_v19 }
  0xea   :  { %v332_v21 = vpop.eup %331 }
  0xeb   :  { %v107_v22 = vadd.f32 1.0, %v332_v21 }
  0xec   :  { %v334_v23 = vpop.eup %333 }
  0xed   :  { %335 = vrcp.f32 %v107_v22  ;;  %v108_v24 = vadd.f32 1.0, %v334_v23 }
  0xef   :  { %337 = vrcp.f32 %v108_v24 }
  0xf7   :  { %v336_v25 = vpop.eup %335 }
  0xf8   :  { %v113_v26 = vmul.f32 %v336_v25, %v92_v15 }
  0xf9   :  { %v338_v27 = vpop.eup %337 }
  0xfa   :  { %v115_v28 = vmul.f32 %v113_v26, %v94_v17  ;;  %v114_v29 = vmul.f32 %v338_v27, %v96_v18 }
  0xfc   :  { %v116_v30 = vmul.f32 %v114_v29, %v98_v20 }
  0xfe   :  { %v117_v31 = vpack.c.bf16 %v116_v30, %v115_v28 }
 0x100   :  { %307 = vmatmul.mubr.bf16.vlgmr.msra.gmra.mrb[0].mxu1 %v117_v31 }
 0x1d3   :  { %v218_v33 = vpop.f32.mrb[0].mxu1 }
 0x1d4   :  { %v225_v35 = vadd.f32 %v218_v33, %v118_v32  ;;  %v308_v36 = vpop.f32.mrb[1].mxu1 }
 0x1d5   :  { %v221_v37 = vpop.f32.mrb[2].mxu1 }
 0x1d6   :  { %227 = vst.msk [vmem:[#allocation2] sm:$0xff] %vm20_vm0, %v225_v35  ;;  %v226_v38 = vadd.f32 %v221_v37, %v119_v34  ;;  %v309_v39 = vpop.f32.mrb[3].mxu1 }
 0x1d8   :  { %228 = vst.msk [vmem:[#allocation2 + $0x8] sm:$0xff] %vm20_vm0, %v226_v38 }
 0x1dd   :  { %v232_v40 = vld [vmem:[#allocation2] sm:$0xff] }
 0x1de   :  { %v279_v41 = vpack.c.bf16 %v232_v40, %v232_v40 }
 0x1df   :  { %v233_v42 = vld [vmem:[#allocation2 + $0x8] sm:$0xff] }
 0x1e0   :  { %v280_v43 = vpack.c.bf16 %v233_v42, %v233_v42  ;;  %243 = vst.msk [vmem:[#allocation3] sm:$0xf] %vm242_vm2, %v279_v41 }
 0x1e2   :  { %244 = vst.msk [vmem:[#allocation3 + $0x4] sm:$0xf] %vm242_vm2, %v280_v43 }
 0x1e3   :  { %350 = shalt.err (!%p347_p4)
}
 0x1e4   :  { %s351_s13 = scalar_lea.hbm %s448_s3, 128 }
 0x1e5   :  { %p352_p5 = scmp.ne.s32.totalorder %s448_s3, %s351_s13  ;;  %p355_p6 = scmp.lt.u32.totalorder %s351_s13, %s448_s3 }
 0x1e7   :  { %p357_p7 = pnand %p355_p6, %p352_p5 }
 0x1e9   :  { %360 = shalt.err (!%p357_p7)
}
 0x1ea   :  { %s367_s18 = smov 64   ;;  %s368_s19 = smov 4  }
 0x1eb   :  { %256 = dma.vmem_to_hbm [thread:$0]  %s251_s9, 128, %s448_s3, [#allocation4], %s367_s18, %s367_s18, %s368_s19  }
 0x1ec   :  { %361 = dma.done.wait [#allocation4], 128  }
 0x1ed   :  { %362 = vsyncadd [#allocation4], 4294967168 }
 0x1ee   :  { %260 = vsyncpa [#allocation4], 1 }

</bundles_post_ra>
